<compile_context>
chip_gen: v6e
topology: v6e:2x2x1
jax: 0.10.0
libtpu: 0.0.40
codegen_flags: <defaults>
</compile_context>

<pallas_src>
import jax
import jax.numpy as jnp
from jax.experimental import pallas as pl
from jax.experimental.pallas import tpu as pltpu
from functools import partial


def _round_up(n, m):
    return ((n + m - 1) // m) * m


def _policy_mlp_kernel(x_ref, w1_ref, b1_ref, w2_ref, b2_ref, w3_ref, b3_ref,
                       o_ref, *, max_action, neg_slope):
    # Layer 1: Linear (bf16 MXU operands, f32 accumulation) + LeakyReLU (f32 VPU).
    # x may arrive as f32 (no wrapper pad) or bf16 (pad+cast fused); the in-kernel
    # cast is a cheap VMEM/VPU op either way.
    x = x_ref[...].astype(jnp.bfloat16)
    h = jnp.dot(x, w1_ref[...], preferred_element_type=jnp.float32) + b1_ref[...]
    h = jnp.maximum(h, neg_slope * h)           # LeakyReLU, neg_slope < 1
    # Layer 2: Linear + LeakyReLU
    h = jnp.dot(h.astype(jnp.bfloat16), w2_ref[...],
                preferred_element_type=jnp.float32) + b2_ref[...]
    h = jnp.maximum(h, neg_slope * h)
    # Layer 3: Linear + Tanh (EUP) scaled by max_action.  Output block is the
    # true (TB, A) shape — masked vst in VMEM, but ~16x fewer HBM write bytes.
    h = jnp.dot(h.astype(jnp.bfloat16), w3_ref[...],
                preferred_element_type=jnp.float32) + b3_ref[...]
    o_ref[...] = (jnp.tanh(h) * max_action).astype(o_ref.dtype)


def init_policy_params(key, dim_state, dim_action, dim_hidden):
    """Deterministic xavier_normal weights (bias = 0), matching init_weight().
    Weights stored as (in_features, out_features) so the kernel computes x @ W + b."""
    def xavier_normal(k, fan_in, fan_out):
        std = (2.0 / (fan_in + fan_out)) ** 0.5
        return std * jax.random.normal(k, (fan_in, fan_out), dtype=jnp.float32)

    k1, k2, k3 = jax.random.split(key, 3)
    return {
        "w1": xavier_normal(k1, dim_state, dim_hidden),
        "b1": jnp.zeros((1, dim_hidden), jnp.float32),
        "w2": xavier_normal(k2, dim_hidden, dim_hidden),
        "b2": jnp.zeros((1, dim_hidden), jnp.float32),
        "w3": xavier_normal(k3, dim_hidden, dim_action),
        "b3": jnp.zeros((1, dim_action), jnp.float32),
    }


def prepare_policy_params(params, mxu_dtype=jnp.bfloat16):
    """One-time: cast weights to bf16 for the MXU; biases stay f32 (added after
    the f32 accumulation).  No zero padding — blocks cover the full arrays."""
    return {
        "w1": params["w1"].astype(mxu_dtype),
        "b1": params["b1"].astype(jnp.float32),
        "w2": params["w2"].astype(mxu_dtype),
        "b2": params["b2"].astype(jnp.float32),
        "w3": params["w3"].astype(mxu_dtype),
        "b3": params["b3"].astype(jnp.float32),
    }


def policy_forward(x, pparams, max_action, *, neg_slope=0.01, batch_tile=512):
    """x: (B, dim_state) float32 (or bf16).  pparams: output of prepare_policy_params."""
    w1, b1 = pparams["w1"], pparams["b1"]
    w2, b2 = pparams["w2"], pparams["b2"]
    w3, b3 = pparams["w3"], pparams["b3"]
    S, H = w1.shape
    A = w3.shape[1]

    B = x.shape[0]
    # Batch tile: multiple of 8 sublanes, capped so the grid has >= 2 steps
    # whenever the batch allows it (v7x has 2 TensorCores; "parallel" only
    # shards a grid with >= 2 iterations).  512 rows sits near the mem-bound
    # roofline knee; working set is well under every generation's VMEM limit.
    B8 = _round_up(B, 8)
    TB = max(8, min(batch_tile, _round_up(pl.cdiv(B8, 2), 8)))
    Bp = _round_up(B8, TB)

    if Bp != B:
        # Pad only the batch dim; fuse the bf16 cast into this single extra
        # copy so it writes half the bytes.  No feature/lane padding in HBM.
        x = jnp.pad(x, ((0, Bp - B), (0, 0))).astype(jnp.bfloat16)

    kernel = partial(_policy_mlp_kernel,
                     max_action=float(max_action), neg_slope=float(neg_slope))

    flops = 2 * Bp * (S * H + H * H + H * A)
    bytes_accessed = (
        Bp * S * x.dtype.itemsize + Bp * A * 4            # streamed x in, out
        + (S * H + H * H + H * A) * w1.dtype.itemsize     # resident weights
        + (2 * H + A) * 4                                 # biases
    )

    out = pl.pallas_call(
        kernel,
        out_shape=jax.ShapeDtypeStruct((Bp, A), jnp.float32),
        grid=(Bp // TB,),
        in_specs=[
            pl.BlockSpec((TB, S), lambda i: (i, 0)),   # x: stream batch tiles, true S lanes
            pl.BlockSpec((S, H), lambda i: (0, 0)),    # weights/biases: constant index_map
            pl.BlockSpec((1, H), lambda i: (0, 0)),    #   -> fetched once, stay resident
            pl.BlockSpec((H, H), lambda i: (0, 0)),
            pl.BlockSpec((1, H), lambda i: (0, 0)),
            pl.BlockSpec((H, A), lambda i: (0, 0)),
            pl.BlockSpec((1, A), lambda i: (0, 0)),
        ],
        out_specs=pl.BlockSpec((TB, A), lambda i: (i, 0)),   # true A lanes: ~16x fewer write bytes
        compiler_params=pltpu.CompilerParams(
            dimension_semantics=("parallel",)),
        cost_estimate=pl.CostEstimate(
            flops=flops, transcendentals=Bp * A, bytes_accessed=bytes_accessed),
    )(x, w1, b1, w2, b2, w3, b3)

    return out[:B]


if __name__ == "__main__":
    # Small shapes consistent with the module (dim_hidden default 256 scaled down).
    batch = 8
    dim_state = 16
    dim_hidden = 32
    dim_action = 8
    max_action = 2.0

    key = jax.random.PRNGKey(0)
    k_param, k_x = jax.random.split(key)

    params = init_policy_params(k_param, dim_state, dim_action, dim_hidden)
    pparams = prepare_policy_params(params)
    x = jax.random.normal(k_x, (batch, dim_state), dtype=jnp.float32)

    out = policy_forward(x, pparams, max_action)
    out = jax.block_until_ready(out)

    # Pure-JAX reference mirroring the kernel's bf16-operand / f32-accum matmuls.
    def ref_bf16(x, p):
        bf = jnp.bfloat16
        h = jnp.dot(x.astype(bf), p["w1"].astype(bf),
                    preferred_element_type=jnp.float32) + p["b1"]
        h = jnp.where(h > 0, h, 0.01 * h)
        h = jnp.dot(h.astype(bf), p["w2"].astype(bf),
                    preferred_element_type=jnp.float32) + p["b2"]
        h = jnp.where(h > 0, h, 0.01 * h)
        h = jnp.dot(h.astype(bf), p["w3"].astype(bf),
                    preferred_element_type=jnp.float32) + p["b3"]
        return jnp.tanh(h) * max_action

    # Full f32 reference (PyTorch-equivalent semantics).
    def ref_f32(x, p):
        h = x @ p["w1"] + p["b1"]
        h = jnp.where(h > 0, h, 0.01 * h)
        h = h @ p["w2"] + p["b2"]
        h = jnp.where(h > 0, h, 0.01 * h)
        h = h @ p["w3"] + p["b3"]
        return jnp.tanh(h) * max_action

    expected = ref_bf16(x, params)
    expected_f32 = ref_f32(x, params)

    assert out.shape == (batch, dim_action)
    assert jnp.allclose(out, expected, atol=5e-3, rtol=5e-3), "mismatch vs bf16 reference"
    assert jnp.allclose(out, expected_f32, atol=5e-2, rtol=5e-2), "mismatch vs f32 reference"

    print("KERNEL_OK")
</pallas_src>

<mosaic_0001>
module attributes {stable_mosaic.version = 11 : i64} {
  func.func @_policy_mlp_kernel(%arg0: i32, %arg1: memref<8x16xf32, #tpu.memory_space<vmem>>, %arg2: memref<16x32xbf16, #tpu.memory_space<vmem>>, %arg3: memref<1x32xf32, #tpu.memory_space<vmem>>, %arg4: memref<32x32xbf16, #tpu.memory_space<vmem>>, %arg5: memref<1x32xf32, #tpu.memory_space<vmem>>, %arg6: memref<32x8xbf16, #tpu.memory_space<vmem>>, %arg7: memref<1x8xf32, #tpu.memory_space<vmem>>, %arg8: memref<8x8xf32, #tpu.memory_space<vmem>>) attributes {dimension_semantics = [#tpu.dimension_semantics<parallel>], iteration_bounds = array<i64: 1>, scalar_prefetch = 0 : i64, scratch_operands = 0 : i64, tpu.core_type = #tpu.core_type<tc>, window_params = [{transform_indices = @transform_0, window_bounds = array<i64: 8, 16>}, {pipeline_mode = #tpu.pipeline_mode<synchronous>, transform_indices = @transform_1, window_bounds = array<i64: 16, 32>}, {pipeline_mode = #tpu.pipeline_mode<synchronous>, transform_indices = @transform_2, window_bounds = array<i64: 1, 32>}, {pipeline_mode = #tpu.pipeline_mode<synchronous>, transform_indices = @transform_3, window_bounds = array<i64: 32, 32>}, {pipeline_mode = #tpu.pipeline_mode<synchronous>, transform_indices = @transform_4, window_bounds = array<i64: 1, 32>}, {pipeline_mode = #tpu.pipeline_mode<synchronous>, transform_indices = @transform_5, window_bounds = array<i64: 32, 8>}, {pipeline_mode = #tpu.pipeline_mode<synchronous>, transform_indices = @transform_6, window_bounds = array<i64: 1, 8>}, {transform_indices = @transform_7, window_bounds = array<i64: 8, 8>}]} {
    %c0 = arith.constant 0 : index
    %c0_0 = arith.constant 0 : index
    %0 = vector.load %arg1[%c0, %c0_0] : memref<8x16xf32, #tpu.memory_space<vmem>>, vector<8x16xf32>
    %1 = arith.truncf %0 : vector<8x16xf32> to vector<8x16xbf16>
    %c0_1 = arith.constant 0 : index
    %c0_2 = arith.constant 0 : index
    %2 = vector.load %arg2[%c0_1, %c0_2] : memref<16x32xbf16, #tpu.memory_space<vmem>>, vector<16x32xbf16>
    %cst = arith.constant dense<0.000000e+00> : vector<8x32xf32>
    %3 = tpu.matmul %1, %2, %cst {dimension_numbers = #tpu.dot_dimension_numbers<[1], [0], [0], [1], [0, 0, 1, 1], [], []>} : vector<8x16xbf16>, vector<16x32xbf16>, vector<8x32xf32> -> vector<8x32xf32>
    %c0_3 = arith.constant 0 : index
    %c0_4 = arith.constant 0 : index
    %4 = vector.load %arg3[%c0_3, %c0_4] : memref<1x32xf32, #tpu.memory_space<vmem>>, vector<1x32xf32>
    %5 = vector.broadcast %4 : vector<1x32xf32> to vector<8x32xf32>
    %6 = arith.addf %3, %5 : vector<8x32xf32>
    %cst_5 = arith.constant 0.00999999977 : f32
    %7 = vector.broadcast %cst_5 : f32 to vector<8x32xf32>
    %8 = arith.mulf %7, %6 : vector<8x32xf32>
    %9 = arith.maximumf %6, %8 : vector<8x32xf32>
    %10 = arith.truncf %9 : vector<8x32xf32> to vector<8x32xbf16>
    %c0_6 = arith.constant 0 : index
    %c0_7 = arith.constant 0 : index
    %11 = vector.load %arg4[%c0_6, %c0_7] : memref<32x32xbf16, #tpu.memory_space<vmem>>, vector<32x32xbf16>
    %cst_8 = arith.constant dense<0.000000e+00> : vector<8x32xf32>
    %12 = tpu.matmul %10, %11, %cst_8 {dimension_numbers = #tpu.dot_dimension_numbers<[1], [0], [0], [1], [0, 0, 1, 1], [], []>} : vector<8x32xbf16>, vector<32x32xbf16>, vector<8x32xf32> -> vector<8x32xf32>
    %c0_9 = arith.constant 0 : index
    %c0_10 = arith.constant 0 : index
    %13 = vector.load %arg5[%c0_9, %c0_10] : memref<1x32xf32, #tpu.memory_space<vmem>>, vector<1x32xf32>
    %14 = vector.broadcast %13 : vector<1x32xf32> to vector<8x32xf32>
    %15 = arith.addf %12, %14 : vector<8x32xf32>
    %cst_11 = arith.constant 0.00999999977 : f32
    %16 = vector.broadcast %cst_11 : f32 to vector<8x32xf32>
    %17 = arith.mulf %16, %15 : vector<8x32xf32>
    %18 = arith.maximumf %15, %17 : vector<8x32xf32>
    %19 = arith.truncf %18 : vector<8x32xf32> to vector<8x32xbf16>
    %c0_12 = arith.constant 0 : index
    %c0_13 = arith.constant 0 : index
    %20 = vector.load %arg6[%c0_12, %c0_13] : memref<32x8xbf16, #tpu.memory_space<vmem>>, vector<32x8xbf16>
    %cst_14 = arith.constant dense<0.000000e+00> : vector<8x8xf32>
    %21 = tpu.matmul %19, %20, %cst_14 {dimension_numbers = #tpu.dot_dimension_numbers<[1], [0], [0], [1], [0, 0, 1, 1], [], []>} : vector<8x32xbf16>, vector<32x8xbf16>, vector<8x8xf32> -> vector<8x8xf32>
    %c0_15 = arith.constant 0 : index
    %c0_16 = arith.constant 0 : index
    %22 = vector.load %arg7[%c0_15, %c0_16] : memref<1x8xf32, #tpu.memory_space<vmem>>, vector<1x8xf32>
    %23 = vector.broadcast %22 : vector<1x8xf32> to vector<8x8xf32>
    %24 = arith.addf %21, %23 : vector<8x8xf32>
    %25 = math.tanh %24 : vector<8x8xf32>
    %cst_17 = arith.constant 2.000000e+00 : f32
    %26 = vector.broadcast %cst_17 : f32 to vector<8x8xf32>
    %27 = arith.mulf %25, %26 : vector<8x8xf32>
    %c0_18 = arith.constant 0 : index
    %c0_19 = arith.constant 0 : index
    %28 = vector.load %arg8[%c0_18, %c0_19] : memref<8x8xf32, #tpu.memory_space<vmem>>, vector<8x8xf32>
    tpu.vector_store %arg8[%c0_18, %c0_19], %27 {strides = array<i32>} : memref<8x8xf32, #tpu.memory_space<vmem>>, vector<8x8xf32>,
    return
  }
  func.func @transform_0(%arg0: i32) -> (i32, i32) {
    %c0_i32 = arith.constant 0 : i32
    %c0_i32_0 = arith.constant 0 : i32
    return %arg0, %c0_i32 : i32, i32
  }
  func.func @transform_1(%arg0: i32) -> (i32, i32) {
    %c0_i32 = arith.constant 0 : i32
    %c0_i32_0 = arith.constant 0 : i32
    %c0_i32_1 = arith.constant 0 : i32
    return %c0_i32, %c0_i32_0 : i32, i32
  }
  func.func @transform_2(%arg0: i32) -> (i32, i32) {
    %c0_i32 = arith.constant 0 : i32
    %c0_i32_0 = arith.constant 0 : i32
    %c0_i32_1 = arith.constant 0 : i32
    return %c0_i32, %c0_i32_0 : i32, i32
  }
  func.func @transform_3(%arg0: i32) -> (i32, i32) {
    %c0_i32 = arith.constant 0 : i32
    %c0_i32_0 = arith.constant 0 : i32
    %c0_i32_1 = arith.constant 0 : i32
    return %c0_i32, %c0_i32_0 : i32, i32
  }
  func.func @transform_4(%arg0: i32) -> (i32, i32) {
    %c0_i32 = arith.constant 0 : i32
    %c0_i32_0 = arith.constant 0 : i32
    %c0_i32_1 = arith.constant 0 : i32
    return %c0_i32, %c0_i32_0 : i32, i32
  }
  func.func @transform_5(%arg0: i32) -> (i32, i32) {
    %c0_i32 = arith.constant 0 : i32
    %c0_i32_0 = arith.constant 0 : i32
    %c0_i32_1 = arith.constant 0 : i32
    return %c0_i32, %c0_i32_0 : i32, i32
  }
  func.func @transform_6(%arg0: i32) -> (i32, i32) {
    %c0_i32 = arith.constant 0 : i32
    %c0_i32_0 = arith.constant 0 : i32
    %c0_i32_1 = arith.constant 0 : i32
    return %c0_i32, %c0_i32_0 : i32, i32
  }
  func.func @transform_7(%arg0: i32) -> (i32, i32) {
    %c0_i32 = arith.constant 0 : i32
    %c0_i32_0 = arith.constant 0 : i32
    return %arg0, %c0_i32 : i32, i32
  }
}

</mosaic_0001>

<bundles_post_ra>
// kernel: tpu_custom_call.1
= control target key start
LH: loop header
LB: loop body
LE: loop exit
PB: predicated region body
PF: predicated region fallthrough
CT: control target
= control target key end

     0   :  { %12 = vsyncpa [#allocation3], 0  ;;  %s474_s0 = inlined_call_operand.vmem [shape: f32[8,16], index: 0, kind: input, shape index: {}]   ;;  %s475_s1 = inlined_call_operand.hbm [shape: bf16[16,32], index: 1, kind: input, shape index: {}]   ;;  %s476_s2 = inlined_call_operand.vmem [shape: f32[1,32], index: 2, kind: input, shape index: {}]   ;;  %s477_s3 = inlined_call_operand.vmem [shape: bf16[32,32], index: 3, kind: input, shape index: {}]   ;;  %s478_s4 = inlined_call_operand.hbm [shape: f32[1,32], index: 4, kind: input, shape index: {}]   ;;  %s479_s5 = inlined_call_operand.vmem [shape: bf16[32,8], index: 5, kind: input, shape index: {}]   ;;  %s480_s6 = inlined_call_operand.vmem [shape: f32[1,8], index: 6, kind: input, shape index: {}]   ;;  %s481_s7 = inlined_call_operand.hbm [shape: f32[8,8], index: 7, kind: output, shape index: {}]  }
   0x1   :  { %13 = vsyncpa [#allocation6], 0 }
   0x2   :  { %14 = vsyncpa [#allocation4], 0  ;;  %s395_s24 = smov [#allocation2]  }
   0x3   :  { %s22_s25 = sshll.u32 %s395_s24, 4  ;;  %s23_s25 = int_to_ptr.vmem [resolvable:$true] %s22_s25 }
   0x4   :  { %s337_s26 = scalar_lea.vmem %s23_s25, 128  ;;  %p342_p1 = scmp.lt.s32.totalorder %s23_s25, %s23_s25 }
   0x5   :  { %p338_p0 = scmp.ne.s32.totalorder %s23_s25, %s337_s26  ;;  %p343_p2 = scmp.lt.s32.totalorder %s337_s26, %s337_s26 }
   0x7   :  { %p344_p3 = por %p343_p2, %p342_p1 }
   0x9   :  { %p345_p4 = pnand %p344_p3, %p338_p0 }
   0xb   :  { %348 = shalt.err (!%p345_p4)
}
   0xc   :  { %s396_s27 = smov 64   ;;  %s397_s28 = smov 4  }
   0xd   :  { %28 = dma.hbm_to_vmem [thread:$0]  %s475_s1, 128, %s23_s25, [#allocation3], %s396_s27, %s396_s27, %s397_s28  }
   0xe   :  { %s398_s8 = smov [#allocation5]  }
   0xf   :  { %s39_s9 = sshll.u32 %s398_s8, 4  ;;  %s40_s9 = int_to_ptr.vmem [resolvable:$true] %s39_s9 }
  0x10   :  { %s357_s10 = scalar_lea.vmem %s40_s9, 16  ;;  %s361_s11 = scalar_lea.vmem %s40_s9, 32 }
  0x11   :  { %p358_p5 = scmp.ne.s32.totalorder %s40_s9, %s357_s10  ;;  %p362_p6 = scmp.lt.s32.totalorder %s40_s9, %s40_s9 }
  0x12   :  { %p363_p7 = scmp.lt.s32.totalorder %s361_s11, %s357_s10 }
  0x14   :  { %p364_p8 = por %p363_p7, %p362_p6 }
  0x16   :  { %p365_p9 = pnand %p364_p8, %p358_p5 }
  0x18   :  { %368 = shalt.err (!%p365_p9)
}
  0x19   :  { %42 = dma.hbm_to_vmem [thread:$0]  %s478_s4, 16, %s40_s9, [#allocation6]  }
  0x1a   :  { %389 = dma.done.wait [#allocation3], 128  }
  0x1b   :  { %390 = vsyncadd [#allocation3], 4294967168 }
  0x1c   :  { %391 = dma.done.wait [#allocation6], 16  }
  0x1d   :  { %392 = vsyncadd [#allocation6], 4294967280  ;;  %v399_v0 = vmov 0.0   ;;  %vm400_vm0 = vmmov 0   ;;  %v322_v1 = vld [vmem:[#allocation2] sm:$0xff]   ;;  %vm71_vm1 = vcmask 130048  }
  0x1e   :  { %293 = vmatprep.subr.bf16.mxu0 %v399_v0  ;;  %295 = vmatprep.mubr.msk.bf16.mxu0 %vm400_vm0, %v399_v0  ;;  %v54_v2 = vld [vmem:[%s474_s0] sm:$0xff]  ;;  %v323_v4 = vld [vmem:[%s477_s3 + $0x8] sm:$0xff]   ;;  %vm141_vm2 = vcmask 261120   ;;  %vm256_vm3 = vcmask 64512  }
  0x1f   :  { %299 = vmatprep.subr.bf16.mxu1 %v399_v0  ;;  %303 = vmatprep.mubr.msk.bf16.mxu1 %vm400_vm0, %v399_v0  ;;  %v55_v3 = vpack.c.bf16 %v54_v2, %v54_v2  ;;  %v324_v5 = vld [vmem:[%s477_s3] sm:$0xff]   ;;  %v325_v15 = vld [vmem:[%s479_s5 + $0x8] sm:$0xff]  }
  0x20   :  { %294 = vmatpush3.bf16.msra.mxu0 %v322_v1  ;;  %300 = vmatpush3.bf16.msra.mxu1 %v323_v4  ;;  %v274_v6 = vld [vmem:[%s476_s2] ss:$0 sm:$0xff]  ;;  %v277_v17 = vld [vmem:[#allocation5] ss:$0 sm:$0xff] }
  0x21   :  { %307 = vmatprep.subr.bf16.mxu0 %v399_v0  ;;  %301 = vmatprep.subr.bf16.mxu1 %v399_v0  ;;  %v326_v16 = vld [vmem:[%s479_s5] sm:$0xff]   ;;  %s401_s5 = smov [#allocation7]  }
  0x22   :  { %v281_v26 = vld [vmem:[%s480_s6] ss:$0 sm:$0xff]  ;;  %s264_s23 = sshll.u32 %s401_s5, 4  ;;  %s265_s23 = int_to_ptr.vmem [resolvable:$true] %s264_s23 }
  0x23   :  { %296 = vmatmul.mubr.msk.bf16.vlgmr.msra.gmra.mxu0 %vm71_vm1, %v55_v3  ;;  %s369_s24 = scalar_lea.vmem %s265_s23, 128  ;;  %p374_p11 = scmp.lt.s32.totalorder %s265_s23, %s265_s23 }
  0x24   :  { %311 = vmatprep.mubr.msk.bf16.mxu0 %vm400_vm0, %v399_v0  ;;  %302 = vmatpush3.bf16.msra.mxu1 %v324_v5  ;;  %p370_p10 = scmp.ne.s32.totalorder %s265_s23, %s369_s24  ;;  %p375_p12 = scmp.lt.s32.totalorder %s369_s24, %s369_s24 }
  0x25   :  { %308 = vmatpush3.bf16.msra.mxu0 %v325_v15 }
  0x26   :  { %309 = vmatprep.subr.bf16.mxu0 %v399_v0  ;;  %p376_p13 = por %p375_p12, %p374_p11 }
  0x28   :  { %p377_p0 = pnand %p376_p13, %p370_p10 }
  0x29   :  { %310 = vmatpush3.bf16.msra.mxu0 %v326_v16 }
  0xe3   :  { %v109_v7 = vpop.f32.mrf.mxu0 }
  0xe4   :  { %v110_v8 = vadd.f32 %v274_v6, %v109_v7 }
  0xe5   :  { %v297_v9 = vpop.f32.mrf.mxu0 }
  0xe6   :  { %v115_v10 = vmul.f32 0.01, %v110_v8 }
  0xe7   :  { %v112_v11 = vpop.f32.mrf.mxu0 }
  0xe8   :  { %v116_v12 = vmax.f32 %v110_v8, %v115_v10 }
  0xe9   :  { %v298_v13 = vpop.f32.mrf.mxu0 }
  0xea   :  { %v117_v14 = vpack.c.bf16 %v116_v12, %v116_v12 }
  0xec   :  { %304 = vmatmul.mubr.msk.bf16.vlgmr.msra.gmra.mxu1 %vm141_vm2, %v117_v14 }
 0x1ac   :  { %v179_v18 = vpop.f32.mrf.mxu1 }
 0x1ad   :  { %v180_v19 = vadd.f32 %v277_v17, %v179_v18 }
 0x1ae   :  { %v305_v20 = vpop.f32.mrf.mxu1 }
 0x1af   :  { %v185_v21 = vmul.f32 0.01, %v180_v19 }
 0x1b0   :  { %v182_v22 = vpop.f32.mrf.mxu1 }
 0x1b1   :  { %v186_v23 = vmax.f32 %v180_v19, %v185_v21 }
 0x1b2   :  { %v306_v24 = vpop.f32.mrf.mxu1 }
 0x1b3   :  { %v187_v25 = vpack.c.bf16 %v186_v23, %v186_v23 }
 0x1b5   :  { %312 = vmatmul.mubr.msk.bf16.vlgmr.msra.gmra.mxu0 %vm141_vm2, %v187_v25 }
 0x275   :  { %v248_v27 = vpop.f32.mrf.mxu0 }
 0x276   :  { %v249_v28 = vadd.f32 %v281_v26, %v248_v27 }
 0x277   :  { %v313_v29 = vpop.f32.mrf.mxu0 }
 0x278   :  { %327 = vtanh.f32 %v249_v28 }
 0x279   :  { %v251_v30 = vpop.f32.mrf.mxu0 }
 0x27b   :  { %v314_v31 = vpop.f32.mrf.mxu0 }
 0x285   :  { %v328_v32 = vpop.eup %327 }
 0x286   :  { %v255_v33 = vmul.f32 2.0, %v328_v32 }
 0x288   :  { %257 = vst.msk [vmem:[#allocation7] sm:$0xff] %vm256_vm3, %v255_v33 }
 0x289   :  { %380 = shalt.err (!%p377_p0)
}
 0x28a   :  { %267 = dma.vmem_to_hbm [thread:$0]  %s265_s23, 128, %s481_s7, [#allocation4]  }
 0x28b   :  { %393 = dma.done.wait [#allocation4], 128  }
 0x28c   :  { %394 = vsyncadd [#allocation4], 4294967168 }
 0x28d   :  { %271 = vsyncpa [#allocation3], 1 }
 0x28e   :  { %272 = vsyncpa [#allocation6], 1 }
 0x28f   :  { %273 = vsyncpa [#allocation4], 1 }

</bundles_post_ra>
